<compile_context>
chip_gen: v5e
topology: v5e:2x2
jax: 0.10.0
libtpu: 0.0.40
codegen_flags: <defaults>
</compile_context>

<pallas_src>
import jax
import jax.numpy as jnp
from jax.experimental import pallas as pl
from jax.experimental.pallas import tpu as pltpu

LANES = 128


def _round_up(n, m):
    return (n + m - 1) // m * m


def simple_gru_forward(x, params):
    """x: (B, in_dim) float32. params: PyTorch-shaped nn.GRU / nn.Linear weights."""
    B, in_dim = x.shape
    H = params["w_ih_l0"].shape[0] // 3
    out_dim = params["fc_w"].shape[0]
    assert 3 * H <= LANES and out_dim <= LANES

    f32 = jnp.float32
    K0 = _round_up(in_dim + 1, 8)     # layer-0 K (x + ones column, sublane pad)
    HP = _round_up(H, 8)              # layer-1 / fc K segment size
    w1_off = K0
    wf_off = K0 + HP
    b_off = K0 + 2 * HP               # 8-row bias block
    R = b_off + 8                     # total slab rows (multiple of 8)

    # ---- pack every weight & bias into one (R, 128) f32 slab (wrapper glue) ----
    slab = jnp.zeros((R, LANES), f32)
    # layer 0: W_ih_l0^T in rows [0, in_dim); combined bias row at `in_dim`
    slab = slab.at[0:in_dim, 0:3 * H].set(params["w_ih_l0"].T.astype(f32))
    bias0 = params["b_ih_l0"] + jnp.concatenate(
        [params["b_hh_l0"][0:2 * H], jnp.zeros((H,), f32)])      # b_hn0 kept apart
    slab = slab.at[in_dim, 0:3 * H].set(bias0.astype(f32))
    # layer 1: W_ih_l1^T
    slab = slab.at[w1_off:w1_off + H, 0:3 * H].set(params["w_ih_l1"].T.astype(f32))
    # fc head: W_fc^T zero-padded to 128 output lanes (lane-dense store)
    slab = slab.at[wf_off:wf_off + H, 0:out_dim].set(params["fc_w"].T.astype(f32))
    # bias block
    slab = slab.at[b_off + 0, 0:H].set(params["b_hh_l0"][2 * H:3 * H].astype(f32))
    bias1 = params["b_ih_l1"] + jnp.concatenate(
        [params["b_hh_l1"][0:2 * H], jnp.zeros((H,), f32)])
    slab = slab.at[b_off + 1, 0:3 * H].set(bias1.astype(f32))
    slab = slab.at[b_off + 2, 0:H].set(params["b_hh_l1"][2 * H:3 * H].astype(f32))
    slab = slab.at[b_off + 3, 0:out_dim].set(params["fc_b"].astype(f32))

    # x with a ones column (folds layer-0 biases into the first MXU pass)
    x_pad = jnp.zeros((B, K0), f32).at[:, 0:in_dim].set(x.astype(f32))
    x_pad = x_pad.at[:, in_dim].set(1.0)

    def kernel(x_ref, w_ref, o_ref):
        # ---- GRU layer 0 (h_prev = 0; biases folded via ones column) ----
        g0 = jnp.dot(x_ref[...], w_ref[0:K0, :],
                     preferred_element_type=jnp.float32)           # (B, 128)
        r0 = jax.nn.sigmoid(g0[:, 0:H])
        z0 = jax.nn.sigmoid(g0[:, H:2 * H])
        n0 = jnp.tanh(g0[:, 2 * H:3 * H] + r0 * w_ref[b_off:b_off + 1, 0:H])
        h1 = (1.0 - z0) * n0                                       # (B, H)

        # ---- GRU layer 1 (h_prev = 0; inter-layer dropout = identity) ----
        g1 = jnp.dot(h1, w_ref[w1_off:w1_off + H, :],
                     preferred_element_type=jnp.float32)           # (B, 128)
        g1 = g1 + w_ref[b_off + 1:b_off + 2, :]
        r1 = jax.nn.sigmoid(g1[:, 0:H])
        z1 = jax.nn.sigmoid(g1[:, H:2 * H])
        n1 = jnp.tanh(g1[:, 2 * H:3 * H] + r1 * w_ref[b_off + 2:b_off + 3, 0:H])
        h2 = (1.0 - z1) * n1                                       # (B, H)

        # ---- Linear head (pre-fc dropout = identity), 128-lane padded out ----
        y = jnp.dot(h2, w_ref[wf_off:wf_off + H, :],
                    preferred_element_type=jnp.float32)            # (B, 128)
        y = y + w_ref[b_off + 3:b_off + 4, :]
        o_ref[...] = y.astype(o_ref.dtype)                         # unmasked vst

    y_pad = pl.pallas_call(
        kernel,
        out_shape=jax.ShapeDtypeStruct((B, LANES), jnp.float32),
        in_specs=[
            pl.BlockSpec(memory_space=pltpu.MemorySpace.VMEM),  # x_pad
            pl.BlockSpec(memory_space=pltpu.MemorySpace.VMEM),  # packed weight slab
        ],
        out_specs=pl.BlockSpec(memory_space=pltpu.MemorySpace.VMEM),
    )(x_pad, slab)
    return y_pad[:, 0:out_dim]


def init_params(key, in_dim, hidden_dim, out_dim):
    """Deterministic PyTorch-like init: U(-1/sqrt(hidden), 1/sqrt(hidden))."""
    ks = jax.random.split(key, 10)
    bound = 1.0 / jnp.sqrt(hidden_dim)

    def u(k, shape):
        return jax.random.uniform(k, shape, jnp.float32, -bound, bound)

    return {
        # nn.GRU layer 0 (gate order r, z, n)
        "w_ih_l0": u(ks[0], (3 * hidden_dim, in_dim)),
        "w_hh_l0": u(ks[1], (3 * hidden_dim, hidden_dim)),  # matmul vanishes: h0 == 0
        "b_ih_l0": u(ks[2], (3 * hidden_dim,)),
        "b_hh_l0": u(ks[3], (3 * hidden_dim,)),
        # nn.GRU layer 1
        "w_ih_l1": u(ks[4], (3 * hidden_dim, hidden_dim)),
        "w_hh_l1": u(ks[5], (3 * hidden_dim, hidden_dim)),  # matmul vanishes: h0 == 0
        "b_ih_l1": u(ks[6], (3 * hidden_dim,)),
        "b_hh_l1": u(ks[7], (3 * hidden_dim,)),
        # fc head
        "fc_w": u(ks[8], (out_dim, hidden_dim)),
        "fc_b": u(ks[9], (out_dim,)),
    }


def reference_forward(x, p):
    """Pure-JAX reference matching PyTorch nn.GRU eval-mode forward (seq=1, h0=0)."""
    H = p["w_ih_l0"].shape[0] // 3

    def gru_layer(inp, w_ih, w_hh, b_ih, b_hh):
        h = jnp.zeros((inp.shape[0], H), jnp.float32)
        gi = inp @ w_ih.T + b_ih
        gh = h @ w_hh.T + b_hh
        r = jax.nn.sigmoid(gi[:, 0:H] + gh[:, 0:H])
        z = jax.nn.sigmoid(gi[:, H:2 * H] + gh[:, H:2 * H])
        n = jnp.tanh(gi[:, 2 * H:] + r * gh[:, 2 * H:])
        return (1.0 - z) * n + z * h

    h1 = gru_layer(x, p["w_ih_l0"], p["w_hh_l0"], p["b_ih_l0"], p["b_hh_l0"])
    h2 = gru_layer(h1, p["w_ih_l1"], p["w_hh_l1"], p["b_ih_l1"], p["b_hh_l1"])
    return h2 @ p["fc_w"].T + p["fc_b"]


if __name__ == "__main__":
    key = jax.random.PRNGKey(0)
    k_x, k_p = jax.random.split(key)

    B, IN_DIM, HIDDEN, OUT_DIM = 8, 16, 32, 2
    x = jax.random.normal(k_x, (B, IN_DIM), dtype=jnp.float32)
    params = init_params(k_p, IN_DIM, HIDDEN, OUT_DIM)

    y = jax.block_until_ready(simple_gru_forward(x, params))
    y_ref = reference_forward(x, params)

    assert y.shape == (B, OUT_DIM)
    assert jnp.allclose(y, y_ref, atol=2e-5, rtol=2e-5), float(jnp.max(jnp.abs(y - y_ref)))

    print("KERNEL_OK")
</pallas_src>

<mosaic_0001>
module attributes {stable_mosaic.version = 11 : i64} {
  func.func @kernel(%arg0: memref<8x24xf32, #tpu.memory_space<vmem>>, %arg1: memref<96x128xf32, #tpu.memory_space<vmem>>, %arg2: memref<8x128xf32, #tpu.memory_space<vmem>>) attributes {dimension_semantics = [], scalar_prefetch = 0 : i64, scratch_operands = 0 : i64, tpu.core_type = #tpu.core_type<tc>} {
    %c0 = arith.constant 0 : index
    %c0_0 = arith.constant 0 : index
    %0 = vector.load %arg0[%c0, %c0_0] : memref<8x24xf32, #tpu.memory_space<vmem>>, vector<8x24xf32>
    %c0_1 = arith.constant 0 : index
    %c0_2 = arith.constant 0 : index
    %1 = vector.load %arg1[%c0_1, %c0_2] : memref<96x128xf32, #tpu.memory_space<vmem>>, vector<24x128xf32>
    %cst = arith.constant dense<0.000000e+00> : vector<8x128xf32>
    %2 = tpu.matmul %0, %1, %cst {dimension_numbers = #tpu.dot_dimension_numbers<[1], [0], [0], [1], [0, 0, 1, 1], [], []>} : vector<8x24xf32>, vector<24x128xf32>, vector<8x128xf32> -> vector<8x128xf32>
    %3 = vector.extract_strided_slice %2 {offsets = [0, 0], sizes = [8, 32], strides = [1, 1]} : vector<8x128xf32> to vector<8x32xf32>
    %4 = arith.negf %3 : vector<8x32xf32>
    %5 = math.exp %4 : vector<8x32xf32>
    %cst_3 = arith.constant 1.000000e+00 : f32
    %6 = vector.broadcast %cst_3 : f32 to vector<8x32xf32>
    %7 = arith.addf %6, %5 : vector<8x32xf32>
    %8 = arith.divf %6, %7 : vector<8x32xf32>
    %9 = vector.extract_strided_slice %2 {offsets = [0, 32], sizes = [8, 32], strides = [1, 1]} : vector<8x128xf32> to vector<8x32xf32>
    %10 = arith.negf %9 : vector<8x32xf32>
    %11 = math.exp %10 : vector<8x32xf32>
    %cst_4 = arith.constant 1.000000e+00 : f32
    %12 = vector.broadcast %cst_4 : f32 to vector<8x32xf32>
    %13 = arith.addf %12, %11 : vector<8x32xf32>
    %14 = arith.divf %12, %13 : vector<8x32xf32>
    %15 = vector.extract_strided_slice %2 {offsets = [0, 64], sizes = [8, 32], strides = [1, 1]} : vector<8x128xf32> to vector<8x32xf32>
    %c88 = arith.constant 88 : index
    %c0_5 = arith.constant 0 : index
    %16 = vector.load %arg1[%c88, %c0_5] : memref<96x128xf32, #tpu.memory_space<vmem>>, vector<1x32xf32>
    %17 = vector.broadcast %16 : vector<1x32xf32> to vector<8x32xf32>
    %18 = arith.mulf %8, %17 : vector<8x32xf32>
    %19 = arith.addf %15, %18 : vector<8x32xf32>
    %20 = math.tanh %19 : vector<8x32xf32>
    %cst_6 = arith.constant 1.000000e+00 : f32
    %21 = vector.broadcast %cst_6 : f32 to vector<8x32xf32>
    %22 = arith.subf %21, %14 : vector<8x32xf32>
    %23 = arith.mulf %22, %20 : vector<8x32xf32>
    %c24 = arith.constant 24 : index
    %c0_7 = arith.constant 0 : index
    %24 = vector.load %arg1[%c24, %c0_7] : memref<96x128xf32, #tpu.memory_space<vmem>>, vector<32x128xf32>
    %cst_8 = arith.constant dense<0.000000e+00> : vector<8x128xf32>
    %25 = tpu.matmul %23, %24, %cst_8 {dimension_numbers = #tpu.dot_dimension_numbers<[1], [0], [0], [1], [0, 0, 1, 1], [], []>} : vector<8x32xf32>, vector<32x128xf32>, vector<8x128xf32> -> vector<8x128xf32>
    %c89 = arith.constant 89 : index
    %c0_9 = arith.constant 0 : index
    %26 = vector.load %arg1[%c89, %c0_9] : memref<96x128xf32, #tpu.memory_space<vmem>>, vector<1x128xf32>
    %27 = vector.broadcast %26 : vector<1x128xf32> to vector<8x128xf32>
    %28 = arith.addf %25, %27 : vector<8x128xf32>
    %29 = vector.extract_strided_slice %28 {offsets = [0, 0], sizes = [8, 32], strides = [1, 1]} : vector<8x128xf32> to vector<8x32xf32>
    %30 = arith.negf %29 : vector<8x32xf32>
    %31 = math.exp %30 : vector<8x32xf32>
    %cst_10 = arith.constant 1.000000e+00 : f32
    %32 = vector.broadcast %cst_10 : f32 to vector<8x32xf32>
    %33 = arith.addf %32, %31 : vector<8x32xf32>
    %34 = arith.divf %32, %33 : vector<8x32xf32>
    %35 = vector.extract_strided_slice %28 {offsets = [0, 32], sizes = [8, 32], strides = [1, 1]} : vector<8x128xf32> to vector<8x32xf32>
    %36 = arith.negf %35 : vector<8x32xf32>
    %37 = math.exp %36 : vector<8x32xf32>
    %cst_11 = arith.constant 1.000000e+00 : f32
    %38 = vector.broadcast %cst_11 : f32 to vector<8x32xf32>
    %39 = arith.addf %38, %37 : vector<8x32xf32>
    %40 = arith.divf %38, %39 : vector<8x32xf32>
    %41 = vector.extract_strided_slice %28 {offsets = [0, 64], sizes = [8, 32], strides = [1, 1]} : vector<8x128xf32> to vector<8x32xf32>
    %c90 = arith.constant 90 : index
    %c0_12 = arith.constant 0 : index
    %42 = vector.load %arg1[%c90, %c0_12] : memref<96x128xf32, #tpu.memory_space<vmem>>, vector<1x32xf32>
    %43 = vector.broadcast %42 : vector<1x32xf32> to vector<8x32xf32>
    %44 = arith.mulf %34, %43 : vector<8x32xf32>
    %45 = arith.addf %41, %44 : vector<8x32xf32>
    %46 = math.tanh %45 : vector<8x32xf32>
    %cst_13 = arith.constant 1.000000e+00 : f32
    %47 = vector.broadcast %cst_13 : f32 to vector<8x32xf32>
    %48 = arith.subf %47, %40 : vector<8x32xf32>
    %49 = arith.mulf %48, %46 : vector<8x32xf32>
    %c56 = arith.constant 56 : index
    %c0_14 = arith.constant 0 : index
    %50 = vector.load %arg1[%c56, %c0_14] : memref<96x128xf32, #tpu.memory_space<vmem>>, vector<32x128xf32>
    %cst_15 = arith.constant dense<0.000000e+00> : vector<8x128xf32>
    %51 = tpu.matmul %49, %50, %cst_15 {dimension_numbers = #tpu.dot_dimension_numbers<[1], [0], [0], [1], [0, 0, 1, 1], [], []>} : vector<8x32xf32>, vector<32x128xf32>, vector<8x128xf32> -> vector<8x128xf32>
    %c91 = arith.constant 91 : index
    %c0_16 = arith.constant 0 : index
    %52 = vector.load %arg1[%c91, %c0_16] : memref<96x128xf32, #tpu.memory_space<vmem>>, vector<1x128xf32>
    %53 = vector.broadcast %52 : vector<1x128xf32> to vector<8x128xf32>
    %54 = arith.addf %51, %53 : vector<8x128xf32>
    %c0_17 = arith.constant 0 : index
    %c0_18 = arith.constant 0 : index
    %55 = vector.load %arg2[%c0_17, %c0_18] : memref<8x128xf32, #tpu.memory_space<vmem>>, vector<8x128xf32>
    tpu.vector_store %arg2[%c0_17, %c0_18], %54 {strides = array<i32>} : memref<8x128xf32, #tpu.memory_space<vmem>>, vector<8x128xf32>,
    return
  }
}

</mosaic_0001>

<bundles_post_ra>
// kernel: tpu_custom_call.1
= control target key start
LH: loop header
LB: loop body
LE: loop exit
PB: predicated region body
PF: predicated region fallthrough
CT: control target
= control target key end

     0   :  { %7 = vsyncpa [#allocation3], 0  ;;  %s365_s0 = inlined_call_operand.hbm [shape: f32[8,24], index: 0, kind: input, shape index: {}]   ;;  %s366_s1 = inlined_call_operand.hbm [shape: f32[96,128], index: 1, kind: input, shape index: {}]   ;;  %s367_s2 = inlined_call_operand.hbm [shape: f32[8,128], index: 2, kind: output, shape index: {}]  }
   0x1   :  { %8 = vsyncpa [#allocation6], 0 }
   0x2   :  { %9 = vsyncpa [#allocation4], 0  ;;  %s15_s11 = sshll.u32 %s365_s0, 4  ;;  %s326_s12 = smov [#allocation2]   ;;  %s16_s11 = int_to_ptr.hbm [resolvable:$true] %s15_s11 }
   0x3   :  { %s17_s13 = sshll.u32 %s326_s12, 4  ;;  %s25_s16 = sshll.u32 %s366_s1, 4  ;;  %s18_s13 = int_to_ptr.vmem [resolvable:$true] %s17_s13  ;;  %s26_s16 = int_to_ptr.hbm [resolvable:$true] %s25_s16 }
   0x4   :  { %20 = dma.hbm_to_vmem [thread:$0]  %s16_s11, 128, %s18_s13, [#allocation3]  }
   0x5   :  { %s327_s17 = smov [#allocation5]   ;;  %s328_s19 = smov 128  }
   0x6   :  { %s27_s18 = sshll.u32 %s327_s17, 4  ;;  %s329_s20 = smov 8   ;;  %s28_s18 = int_to_ptr.vmem [resolvable:$true] %s27_s18 }
   0x7   :  { %33 = dma.hbm_to_vmem [thread:$0]  %s26_s16, 1536, %s28_s18, [#allocation6], %s328_s19, %s328_s19, %s329_s20  }
   0x8   :  { %320 = dma.done.wait [#allocation3], 128  }
   0x9   :  { %321 = vsyncadd [#allocation3], 4294967168 }
   0xa   :  { %322 = dma.done.wait [#allocation6], 1536  }
   0xb   :  { %323 = vsyncadd [#allocation6], 4294965760  ;;  %v45_v0 = vld [vmem:[#allocation5 + $0x10] sm:$0xff]  ;;  %v44_v1 = vld [vmem:[#allocation5 + $0x8] sm:$0xff]  ;;  %vm46_vm0 = vcmask 195584   ;;  %s330_s0 = smov 64  }
   0xc   :  { %63 = vmatpush.msra.mxu0 %v45_v0  ;;  %v43_v2 = vld [vmem:[#allocation5] sm:$0xff]  ;;  %v42_v3 = vld [vmem:[#allocation2] sm:$0xff]  ;;  %s331_s1 = smov 96   ;;  %v107_v23 = vld [vmem:[#allocation5 + $0x30] sm:$0xff]  ;;  %vm113_vm5 = vcmask 261120   ;;  %s332_s21 = smov [#allocation7]  }
   0xd   :  { %v232_v15 = vld [vmem:[#allocation5 + $0x58] ss:$0 sm:$0xff]  ;;  %v106_v24 = vld [vmem:[#allocation5 + $0x28] sm:$0xff]  ;;  %128 = vmatpush.msra.mxu1 %v107_v23  ;;  %v105_v25 = vld [vmem:[#allocation5 + $0x20] sm:$0xff]  ;;  %s207_s22 = sshll.u32 %s332_s21, 4  ;;  %s209_s25 = sshll.u32 %s367_s2, 4  ;;  %s208_s22 = int_to_ptr.vmem [resolvable:$true] %s207_s22  ;;  %s210_s25 = int_to_ptr.hbm [resolvable:$true] %s209_s25 }
   0xe   :  { %64 = vmatpush.msra.mxu0 %v44_v1  ;;  %v104_v26 = vld [vmem:[#allocation5 + $0x18] sm:$0xff]  ;;  %v173_v52 = vld [vmem:[#allocation5 + $0x50] sm:$0xff]  ;;  %v172_v53 = vld [vmem:[#allocation5 + $0x48] sm:$0xff] }
   0xf   :  { %129 = vmatpush.msra.mxu1 %v106_v24  ;;  %v233_v31 = vld [vmem:[#allocation5 + $0x59] ss:$0 sm:$0xff]  ;;  %v234_v44 = vld [vmem:[#allocation5 + $0x5a] ss:$0 sm:$0xff]  ;;  %193 = vmatpush.msra.mxu2 %v173_v52  ;;  %v171_v54 = vld [vmem:[#allocation5 + $0x40] sm:$0xff] }
  0x10   :  { %65 = vmatpush.msra.mxu0 %v43_v2  ;;  %v170_v55 = vld [vmem:[#allocation5 + $0x38] sm:$0xff] }
  0x11   :  { %220 = vmatmul.msk.f32.vlgmr.msra.gmra.mxu0 %vm46_vm0, %v42_v3  ;;  %130 = vmatpush.msra.mxu1 %v105_v25  ;;  %v235_v60 = vld [vmem:[#allocation5 + $0x5b] ss:$0 sm:$0xff] }
  0x12   :  { %194 = vmatpush.msra.mxu2 %v172_v53 }
  0x13   :  { %131 = vmatpush.msra.mxu1 %v104_v26 }
  0x14   :  { %195 = vmatpush.msra.mxu2 %v171_v54 }
  0x16   :  { %196 = vmatpush.msra.mxu2 %v170_v55 }
  0x8e   :  { %v67_v4 = vpop.f32.mrf.mxu0 }
  0x8f   :  { %v221_v5 = vmul.f32 -1.442695, %v67_v4 }
  0x91   :  { %236 = vpow2.f32 %v221_v5 }
  0x97   :  { %v237_v6 = vpop.eup %236 }
  0x98   :  { %v73_v7 = vadd.f32 1.0, %v237_v6 }
  0x9a   :  { %238 = vrcp.f32 %v73_v7  ;;  %v85_v11 = vand.u32 2147483648, %v73_v7  ;;  %v83_v13 = vand.u32 2147483647, %v73_v7  ;;  %vm79_vm2 = vweird.f32 %v73_v7 }
  0x9c   :  { %v86_v16 = vor.u32 1.1754944e-38, %v85_v11  ;;  %vm84_vm4 = vcmp.eq.f32.partialorder %v83_v13, 8.507059e+37 }
  0xa0   :  { %v239_v8 = vpop.eup %238 }
  0xa1   :  { %v75_v9 = vmul.f32 %v239_v8, %v73_v7  ;;  %vm80_vm1 = vweird.f32 %v239_v8 }
  0xa2   :  { %vm81_vm3 = vmor %vm79_vm2, %vm80_vm1 }
  0xa3   :  { %v76_v10 = vsub.f32 1.0, %v75_v9 }
  0xa5   :  { %v77_v12 = vmul.f32 %v239_v8, %v76_v10 }
  0xa7   :  { %v78_v14 = vadd.f32 %v239_v8, %v77_v12 }
  0xa9   :  { %v82_v17 = vsel %vm81_vm3, %v239_v8, %v78_v14 }
  0xaa   :  { %v87_v18 = vsel %vm84_vm4, %v86_v16, %v82_v17 }
  0xab   :  { %v91_v19 = vmul.f32 %v232_v15, %v87_v18  ;;  %v98_v27 = vsub.f32 1.0, %v87_v18 }
  0xad   :  { %93 = vrot.lane.b32.xlu0 %v91_v19, %s330_s0 }
 0x11f   :  { %v94_v20 = vpop.permute.xlu0 %93 }
 0x120   :  { %v96_v21 = vadd.f32 %v94_v20, %v67_v4 }
 0x122   :  { %240 = vtanh.f32 %v96_v21 }
 0x128   :  { %v241_v22 = vpop.eup %240 }
 0x129   :  { %100 = vrot.lane.b32.xlu0 %v241_v22, %s331_s1 }
 0x19b   :  { %v101_v28 = vpop.permute.xlu0 %100 }
 0x19c   :  { %v103_v29 = vmul.f32 %v101_v28, %v98_v27 }
 0x19e   :  { %111 = vrot.lane.b32.xlu1 %v103_v29, %s331_s1 }
 0x210   :  { %v112_v30 = vpop.permute.xlu1 %111 }
 0x211   :  { %222 = vmatmul.msk.f32.vlgmr.msra.gmra.mxu1 %vm113_vm5, %v112_v30 }
 0x28e   :  { %v133_v32 = vpop.f32.mrf.mxu1 }
 0x28f   :  { %v134_v33 = vadd.f32 %v233_v31, %v133_v32 }
 0x291   :  { %v223_v34 = vmul.f32 -1.442695, %v134_v33 }
 0x293   :  { %242 = vpow2.f32 %v223_v34 }
 0x299   :  { %v243_v35 = vpop.eup %242 }
 0x29a   :  { %v139_v36 = vadd.f32 1.0, %v243_v35 }
 0x29c   :  { %244 = vrcp.f32 %v139_v36  ;;  %v151_v40 = vand.u32 2147483648, %v139_v36  ;;  %v149_v42 = vand.u32 2147483647, %v139_v36  ;;  %vm145_vm7 = vweird.f32 %v139_v36 }
 0x29e   :  { %v152_v45 = vor.u32 1.1754944e-38, %v151_v40  ;;  %vm150_vm9 = vcmp.eq.f32.partialorder %v149_v42, 8.507059e+37 }
 0x2a2   :  { %v245_v37 = vpop.eup %244 }
 0x2a3   :  { %v141_v38 = vmul.f32 %v245_v37, %v139_v36  ;;  %vm146_vm6 = vweird.f32 %v245_v37 }
 0x2a4   :  { %vm147_vm8 = vmor %vm145_vm7, %vm146_vm6 }
 0x2a5   :  { %v142_v39 = vsub.f32 1.0, %v141_v38 }
 0x2a7   :  { %v143_v41 = vmul.f32 %v245_v37, %v142_v39 }
 0x2a9   :  { %v144_v43 = vadd.f32 %v245_v37, %v143_v41 }
 0x2ab   :  { %v148_v46 = vsel %vm147_vm8, %v245_v37, %v144_v43 }
 0x2ac   :  { %v153_v47 = vsel %vm150_vm9, %v152_v45, %v148_v46 }
 0x2ad   :  { %v157_v48 = vmul.f32 %v234_v44, %v153_v47  ;;  %v164_v56 = vsub.f32 1.0, %v153_v47 }
 0x2af   :  { %159 = vrot.lane.b32.xlu1 %v157_v48, %s330_s0 }
 0x321   :  { %v160_v49 = vpop.permute.xlu1 %159 }
 0x322   :  { %v162_v50 = vadd.f32 %v160_v49, %v134_v33 }
 0x324   :  { %246 = vtanh.f32 %v162_v50 }
 0x32a   :  { %v247_v51 = vpop.eup %246 }
 0x32b   :  { %166 = vrot.lane.b32.xlu2 %v247_v51, %s331_s1 }
 0x385   :  { %v167_v57 = vpop.permute.xlu2 %166 }
 0x386   :  { %v169_v58 = vmul.f32 %v167_v57, %v164_v56 }
 0x388   :  { %177 = vrot.lane.b32.xlu2 %v169_v58, %s331_s1 }
 0x3e2   :  { %v178_v59 = vpop.permute.xlu2 %177 }
 0x3e3   :  { %224 = vmatmul.msk.f32.vlgmr.msra.gmra.mxu2 %vm113_vm5, %v178_v59 }
 0x466   :  { %v198_v61 = vpop.f32.mrf.mxu2 }
 0x467   :  { %v199_v62 = vadd.f32 %v235_v60, %v198_v61 }
 0x469   :  { %201 = vst [vmem:[#allocation7] sm:$0xff] %v199_v62 }
 0x46a   :  { %212 = dma.vmem_to_hbm [thread:$0]  %s208_s22, 128, %s210_s25, [#allocation4]  }
 0x46b   :  { %324 = dma.done.wait [#allocation4], 128  }
 0x46c   :  { %325 = vsyncadd [#allocation4], 4294967168 }
 0x46d   :  { %217 = vsyncpa [#allocation3], 1 }
 0x46e   :  { %218 = vsyncpa [#allocation6], 1 }
 0x46f   :  { %219 = vsyncpa [#allocation4], 1 }

</bundles_post_ra>
